<compile_context>
chip_gen: v5e
topology: v5e:2x2
jax: 0.10.0
libtpu: 0.0.40
codegen_flags: <defaults>
</compile_context>

<pallas_src>
import jax
import jax.numpy as jnp
from jax.experimental import pallas as pl
from jax.experimental.pallas import tpu as pltpu


def _center_loss_kernel(labels_ref, x_ref, centers_ref, out_ref):
    """One batch tile: per-row squared distance to the labeled center.

    labels_ref : (TB, 1) int32   (label < 0 or >= C  -> row contributes 0)
    x_ref      : (TB, D) f32
    centers_ref: (C,  D) f32     (full table, resident across the grid)
    out_ref    : (TB, 1) f32     per-row masked distance (partial results)
    """
    x = x_ref[...].astype(jnp.float32)          # (TB, D)
    c = centers_ref[...].astype(jnp.float32)    # (C, D)
    labels = labels_ref[...]                    # (TB, 1) int32

    tb = x.shape[0]
    num_classes = c.shape[0]

    # One-hot row selector (exact in f32: entries are 0.0 / 1.0).
    classes = jax.lax.broadcasted_iota(jnp.int32, (tb, num_classes), 1)
    onehot = (labels == classes).astype(jnp.float32)            # (TB, C)

    # Gather the labeled center per row on the MXU; centers used in native
    # (C, D) layout -> no transpose / XLU work.
    gathered = jax.lax.dot_general(
        onehot, c,
        dimension_numbers=(((1,), (0,)), ((), ())),
        preferred_element_type=jnp.float32,
    )                                                            # (TB, D)

    # Fused norm terms: never build a (TB, C) distmat.
    valid = jnp.sum(onehot, axis=1, keepdims=True)               # (TB, 1) 1.0 iff label in range
    x_sq = jnp.sum(x * x, axis=1, keepdims=True)                 # (TB, 1)
    g_sq = jnp.sum(gathered * gathered, axis=1, keepdims=True)   # (TB, 1)
    cross = jnp.sum(x * gathered, axis=1, keepdims=True)         # (TB, 1)

    # Rows with out-of-range labels: onehot row is all zeros -> gathered == 0,
    # g_sq == cross == 0, valid == 0  => contribution exactly 0 (matches torch).
    out_ref[...] = valid * x_sq + g_sq - 2.0 * cross


def center_loss(x, labels, centers, *, reduction="mean", batch_tile=512):
    """x: (B, D) f32, labels: (B,) int, centers: (C, D) f32 -> scalar loss."""
    B, D = x.shape
    C, _ = centers.shape

    x = x.astype(jnp.float32)
    centers = centers.astype(jnp.float32)
    labels2d = labels.reshape(B, 1).astype(jnp.int32)

    # Sublane-aligned batch tile; pad remainder rows with an invalid label so
    # they contribute exactly zero to the sum.
    tb = int(min(batch_tile, B))
    tb = max(8, ((tb + 7) // 8) * 8)
    num_tiles = -(-B // tb)
    b_pad = num_tiles * tb
    if b_pad != B:
        x = jnp.pad(x, ((0, b_pad - B), (0, 0)))
        labels2d = jnp.pad(labels2d, ((0, b_pad - B), (0, 0)), constant_values=-1)

    per_row = pl.pallas_call(
        _center_loss_kernel,
        out_shape=jax.ShapeDtypeStruct((b_pad, 1), jnp.float32),
        grid_spec=pl.GridSpec(
            grid=(num_tiles,),
            in_specs=[
                pl.BlockSpec((tb, 1), lambda i: (i, 0)),   # labels tile
                pl.BlockSpec((tb, D), lambda i: (i, 0)),   # x tile
                pl.BlockSpec((C, D), lambda i: (0, 0)),    # centers, resident
            ],
            out_specs=pl.BlockSpec((tb, 1), lambda i: (i, 0)),
        ),
        compiler_params=pltpu.CompilerParams(
            dimension_semantics=("parallel",),
        ),
    )(labels2d, x, centers)

    total = jnp.sum(per_row)
    if reduction == "mean":
        # Module semantics: mean over all B*C mask elements (not over batch only).
        return total / jnp.float32(B * C)
    elif reduction == "sum":
        return total
    raise ValueError(f"unsupported reduction: {reduction}")


if __name__ == "__main__":
    key = jax.random.PRNGKey(0)
    k_x, k_c, k_l = jax.random.split(key, 3)

    batch = 32
    feat_dim = 128
    num_classes = 16

    x = jax.random.normal(k_x, (batch, feat_dim), dtype=jnp.float32)
    # deterministic "randn" init of the centers parameter (nn.Parameter(torch.randn(...)))
    centers = jax.random.normal(k_c, (num_classes, feat_dim), dtype=jnp.float32)
    labels = jax.random.randint(k_l, (batch,), 0, num_classes, dtype=jnp.int32)

    # batch_tile=8 -> grid of 4 batch tiles, exercising the tiled/parallel path.
    loss = center_loss(x, labels, centers, batch_tile=8)
    jax.block_until_ready(loss)

    # pure-JAX reference mirroring the PyTorch forward exactly
    distmat = (
        jnp.sum(x * x, axis=1, keepdims=True)
        + jnp.sum(centers * centers, axis=1)[None, :]
        - 2.0 * x @ centers.T
    )
    mask = (labels[:, None] == jnp.arange(num_classes)[None, :]).astype(jnp.float32)
    ref = jnp.mean(distmat * mask)
    assert jnp.allclose(loss, ref, rtol=1e-4, atol=1e-4), (loss, ref)

    print("KERNEL_OK")
</pallas_src>

<mosaic_0001>
module attributes {stable_mosaic.version = 11 : i64} {
  func.func @_center_loss_kernel(%arg0: i32, %arg1: memref<8x1xi32, #tpu.memory_space<vmem>>, %arg2: memref<8x128xf32, #tpu.memory_space<vmem>>, %arg3: memref<16x128xf32, #tpu.memory_space<vmem>>, %arg4: memref<8x1xf32, #tpu.memory_space<vmem>>) attributes {dimension_semantics = [#tpu.dimension_semantics<parallel>], iteration_bounds = array<i64: 4>, scalar_prefetch = 0 : i64, scratch_operands = 0 : i64, tpu.core_type = #tpu.core_type<tc>, window_params = [{transform_indices = @transform_0, window_bounds = array<i64: 8, 1>}, {transform_indices = @transform_1, window_bounds = array<i64: 8, 128>}, {pipeline_mode = #tpu.pipeline_mode<synchronous>, transform_indices = @transform_2, window_bounds = array<i64: 16, 128>}, {transform_indices = @transform_3, window_bounds = array<i64: 8, 1>}]} {
    %c0 = arith.constant 0 : index
    %c0_0 = arith.constant 0 : index
    %0 = vector.load %arg2[%c0, %c0_0] : memref<8x128xf32, #tpu.memory_space<vmem>>, vector<8x128xf32>
    %c0_1 = arith.constant 0 : index
    %c0_2 = arith.constant 0 : index
    %1 = vector.load %arg3[%c0_1, %c0_2] : memref<16x128xf32, #tpu.memory_space<vmem>>, vector<16x128xf32>
    %c0_3 = arith.constant 0 : index
    %c0_4 = arith.constant 0 : index
    %2 = vector.load %arg1[%c0_3, %c0_4] : memref<8x1xi32, #tpu.memory_space<vmem>>, vector<8x1xi32>
    %3 = tpu.iota {dimensions = array<i32: 1>} : vector<8x16xi32>
    %4 = vector.broadcast %2 : vector<8x1xi32> to vector<8x16xi32>
    %5 = arith.cmpi eq, %4, %3 : vector<8x16xi32>
    %6 = arith.extui %5 : vector<8x16xi1> to vector<8x16xi32>
    %7 = arith.sitofp %6 : vector<8x16xi32> to vector<8x16xf32>
    %cst = arith.constant dense<0.000000e+00> : vector<8x128xf32>
    %8 = tpu.matmul %7, %1, %cst {dimension_numbers = #tpu.dot_dimension_numbers<[1], [0], [0], [1], [0, 0, 1, 1], [], []>} : vector<8x16xf32>, vector<16x128xf32>, vector<8x128xf32> -> vector<8x128xf32>
    %cst_5 = arith.constant dense<0.000000e+00> : vector<8xf32>
    %9 = vector.multi_reduction <add>, %7, %cst_5 [1] : vector<8x16xf32> to vector<8xf32>
    %10 = vector.shape_cast %9 : vector<8xf32> to vector<8x1xf32>
    %11 = arith.mulf %0, %0 : vector<8x128xf32>
    %cst_6 = arith.constant dense<0.000000e+00> : vector<8xf32>
    %12 = vector.multi_reduction <add>, %11, %cst_6 [1] : vector<8x128xf32> to vector<8xf32>
    %13 = vector.shape_cast %12 : vector<8xf32> to vector<8x1xf32>
    %14 = arith.mulf %8, %8 : vector<8x128xf32>
    %cst_7 = arith.constant dense<0.000000e+00> : vector<8xf32>
    %15 = vector.multi_reduction <add>, %14, %cst_7 [1] : vector<8x128xf32> to vector<8xf32>
    %16 = vector.shape_cast %15 : vector<8xf32> to vector<8x1xf32>
    %17 = arith.mulf %0, %8 : vector<8x128xf32>
    %cst_8 = arith.constant dense<0.000000e+00> : vector<8xf32>
    %18 = vector.multi_reduction <add>, %17, %cst_8 [1] : vector<8x128xf32> to vector<8xf32>
    %19 = vector.shape_cast %18 : vector<8xf32> to vector<8x1xf32>
    %20 = arith.mulf %10, %13 : vector<8x1xf32>
    %21 = arith.addf %20, %16 : vector<8x1xf32>
    %cst_9 = arith.constant 2.000000e+00 : f32
    %22 = vector.broadcast %cst_9 : f32 to vector<8x1xf32>
    %23 = arith.mulf %22, %19 : vector<8x1xf32>
    %24 = arith.subf %21, %23 : vector<8x1xf32>
    %c0_10 = arith.constant 0 : index
    %c0_11 = arith.constant 0 : index
    %25 = vector.load %arg4[%c0_10, %c0_11] : memref<8x1xf32, #tpu.memory_space<vmem>>, vector<8x1xf32>
    tpu.vector_store %arg4[%c0_10, %c0_11], %24 {strides = array<i32>} : memref<8x1xf32, #tpu.memory_space<vmem>>, vector<8x1xf32>,
    return
  }
  func.func @transform_0(%arg0: i32) -> (i32, i32) {
    %c0_i32 = arith.constant 0 : i32
    %c0_i32_0 = arith.constant 0 : i32
    return %arg0, %c0_i32 : i32, i32
  }
  func.func @transform_1(%arg0: i32) -> (i32, i32) {
    %c0_i32 = arith.constant 0 : i32
    %c0_i32_0 = arith.constant 0 : i32
    return %arg0, %c0_i32 : i32, i32
  }
  func.func @transform_2(%arg0: i32) -> (i32, i32) {
    %c0_i32 = arith.constant 0 : i32
    %c0_i32_0 = arith.constant 0 : i32
    %c0_i32_1 = arith.constant 0 : i32
    return %c0_i32, %c0_i32_0 : i32, i32
  }
  func.func @transform_3(%arg0: i32) -> (i32, i32) {
    %c0_i32 = arith.constant 0 : i32
    %c0_i32_0 = arith.constant 0 : i32
    return %arg0, %c0_i32 : i32, i32
  }
}

</mosaic_0001>

<bundles_post_ra>
// kernel: tpu_custom_call.1
= control target key start
LH: loop header
LB: loop body
LE: loop exit
PB: predicated region body
PF: predicated region fallthrough
CT: control target
= control target key end

     0   :  { %8 = vsyncpa [#allocation3], 0  ;;  %s436_s12 = smov 0   ;;  %s464_s0 = inlined_call_operand.vmem [shape: s32[32,1], index: 0, kind: input, shape index: {}]   ;;  %s465_s1 = inlined_call_operand.vmem [shape: f32[32,128], index: 1, kind: input, shape index: {}]   ;;  %s466_s2 = inlined_call_operand.hbm [shape: f32[16,128], index: 2, kind: input, shape index: {}]   ;;  %s467_s3 = inlined_call_operand.vmem [shape: f32[32,1], index: 3, kind: output, shape index: {}]  }
   0x1 LB: > { %s129_s15 = sshll.u32 %s466_s2, 4  ;;  %s331_s16 = sadd.s32 4294967295, %s409_s12   ;;  %s409_s12 = sphi %s436_s12, %s14_s12   ;;  %s130_s15 = int_to_ptr.hbm [resolvable:$true] %s129_s15 }
   0x2   : > { %p333_p0 = scmp.ge.s32.totalorder %s409_s12, 1  ;;  %p118_p1 = scmp.lt.s32.totalorder %s409_s12, 5 }
   0x3   : > { %p353_p2 = scmp.eq.s32.totalorder %s331_s16, 0  ;;  %s411_s17 = smov [#allocation2]  }
   0x4   : > { %p119_p3 = pnand %p333_p0, %p118_p1  ;;  %s131_s18 = sshll.u32 %s411_s17, 4  ;;  %s132_s18 = int_to_ptr.vmem [resolvable:$true] %s131_s18 }
   0x5   : > { %s412_s19 = smov 128   ;;  %s413_s20 = smov 8  }
   0x6   : > { %p349_p4 = pneg %p119_p3  ;;  %161 = sbr.rel (%p119_p3) target bundleno = 384 (0x180), region = 32 }
   0x8   : > { %p350_p5 = pnand %p353_p2, %p349_p4 }
   0xa   : > { %352 = dma.hbm_to_vmem [thread:$0]  (!%p350_p5), %s130_s15, 256, %s132_s18, [#allocation3], %s412_s19, %s412_s19, %s413_s20  }
   0xb   : > { %404 = dma.done.wait (%p353_p2), [#allocation3], 256  }
   0xc   : > { %406 = vsyncadd (%p353_p2), [#allocation3], 4294967040  ;;  %p188_p6 = scmp.lt.s32.totalorder %s331_s16, 3  ;;  %v414_v0 = vmov 0   ;;  %v202_v2 = vld [vmem:[#allocation2 + $0x8] sm:$0xff]  ;;  %v201_v3 = vld [vmem:[#allocation2] sm:$0xff]  ;;  %v204_v6 = vlaneseq }
   0xd   : > { %368 = vset.pattern.permute.xlu0 %v414_v0  ;;  %230 = vmatpush.msra.mxu0 %v202_v2  ;;  %vm212_vm0 = vcmask 130048   ;;  %v415_v9 = vmov 0.0   ;;  %vm252_vm2 = vcmask 7168  }
   0xe   : > { %s469_s16 = smov (!%p188_p6, %s331_s16), 3  ;;  %v205_v7 = vand.u32 127, %v204_v6 }
   0xf   : > { %s447_s21 = sshll.u32 %s469_s16, 3  ;;  %231 = vmatpush.msra.mxu0 %v201_v3 }
  0x10   : > { %s191_s24 = scalar_lea.vmem %s464_s0, %s447_s21  ;;  %s195_s27 = scalar_lea.vmem %s465_s1, %s447_s21 }
  0x11   : > { %v203_v1 = vld [vmem:[%s191_s24] sm:$0xff]  ;;  %s199_s30 = scalar_lea.vmem %s467_s3, %s447_s21 }
  0x12   : > { %207 = vperm.xlu0 %368, %v203_v1   ;;  %v200_v4 = vld [vmem:[%s195_s27] sm:$0xff] }
  0x13   : > { %v239_v5 = vmul.f32 %v200_v4, %v200_v4 }
  0x15   : > { %240 = vadd.xlane.f32.xlu1 %v239_v5 }
  0x84   : > { %v208_v8 = vpop.permute.xlu0 %207 }
  0x85   : > { %vm209_vm1 = vcmp.eq.s32.totalorder %v208_v8, %v205_v7 }
  0x86   : > { %v341_v10 = vsel %vm209_vm1, 1.0, %v415_v9 }
  0x87   : > { %342 = vmatmul.msk.f32.vlgmr.msra.gmra.mxu0 %vm212_vm0, %v341_v10  ;;  %v236_v11 = vsel %vm212_vm0, %v341_v10, 0.0 }
  0x88   : > { %237 = vadd.xlane.f32.xlu0 %v236_v11  ;;  %v241_v15 = vpop.xlane.xlu1 %240 }
  0xfb   : > { %v238_v16 = vpop.xlane.xlu0 %237 }
  0xfc   : > { %v248_v17 = vmul.f32 %v241_v15, %v238_v16 }
 0x104   : > { %v233_v12 = vpop.f32.mrf.mxu0 }
 0x105   : > { %v242_v13 = vmul.f32 %v233_v12, %v233_v12  ;;  %v245_v14 = vmul.f32 %v233_v12, %v200_v4 }
 0x107   : > { %246 = vadd.xlane.f32.xlu2 %v245_v14  ;;  %243 = vadd.xlane.f32.xlu1 %v242_v13 }
 0x17a   : > { %v247_v18 = vpop.xlane.xlu2 %246  ;;  %v244_v19 = vpop.xlane.xlu1 %243 }
 0x17b   : > { %v250_v20 = vmul.f32 2.0, %v247_v18  ;;  %v249_v21 = vadd.f32 %v248_v17, %v244_v19 }
 0x17d   : > { %v251_v22 = vsub.f32 %v249_v21, %v250_v20 }
 0x17f   : > { %253 = vst.msk [vmem:[%s199_s30] sm:$0xff] %vm252_vm2, %v251_v22 }
 0x180 PF: > { %s14_s12 = sadd.s32 1, %s409_s12  }
 0x181   : > { %p11_p7 = scmp.ge.s32.totalorder %s14_s12, 6  }
 0x183   :  { %13 = sbr.rel (!%p11_p7) target bundleno = 1 (0x1), region = 70 }
 0x188   :  { %273 = vsyncpa [#allocation3], 1 }
 0x189   :  { %275 = vsyncpa [#allocation3 + $0x1], 1 }

</bundles_post_ra>
